<compile_context>
chip_gen: v5e
topology: v5e:2x2
jax: 0.10.0
libtpu: 0.0.40
codegen_flags: <defaults>
</compile_context>

<pallas_src>
import functools

import jax
import jax.numpy as jnp
from jax import lax
from jax.experimental import pallas as pl
from jax.experimental.pallas import tpu as pltpu


def _round_up(x, m):
    return (x + m - 1) // m * m


# ----------------------------------------------------------------------------
# Pallas kernel: fused 3x3 conv (tap-stacked single dot) + bias + mish for a
# block of bblk images.
# ----------------------------------------------------------------------------
def _conv_mish_kernel(x_ref, w_ref, b_ref, o_ref, rhs_ref, *, wpad, q_pad, bblk):
    """
    x_ref:   (bblk, C_in, P)       bf16  zero-padded images, spatial flattened
    w_ref:   (C_out, 9*C_in)       bf16  tap-stacked weights, K = (ky*3+kx)*C_in + ci
    b_ref:   (C_out, 1)            f32   bias
    o_ref:   (bblk, C_out, Qp)     bf16  pixel (h, w) lives at lane q = h*wpad + w
                                         (lanes >= H*wpad or w >= W are junk)
    rhs_ref: (9*C_in, bblk*Qp)     bf16  scratch: tap-stacked, image-concat RHS
    """
    c_in = x_ref.shape[1]

    # Build the stacked RHS once per step.  These 9 lane-misaligned slices per
    # image are the only XLU work; the single big dot then reads aligned scratch.
    for b in range(bblk):
        xb = x_ref[b]                                   # (C_in, P), load once
        for ky in range(3):
            for kx in range(3):
                t = ky * 3 + kx
                d = ky * wpad + kx                      # flat shift of this tap
                rhs_ref[t * c_in:(t + 1) * c_in,
                        b * q_pad:(b + 1) * q_pad] = xb[:, d:d + q_pad]

    # One MXU contraction over K = 9*C_in (instead of 9 accumulated K=C_in
    # dots): better MXU fill, no repeated f32 accumulator VMEM round-trips.
    acc = jnp.dot(w_ref[...], rhs_ref[...], preferred_element_type=jnp.float32)
    acc = acc + b_ref[...]                              # (C_out, 1) lane-broadcast

    # mish(x) = x * tanh(softplus(x)) = x * (u^2 + 2u) / (u^2 + 2u + 2), u = e^x.
    # Clamp exp arg: for x >= 30 the ratio is 1 to f32 precision anyway.
    u = jnp.exp(jnp.minimum(acc, 30.0))
    nm = u * (u + 2.0)
    y = (acc * nm * pl.reciprocal(nm + 2.0, approx=True)).astype(o_ref.dtype)

    # Per-image stores: static, lane-aligned slices (q_pad is a multiple of 128).
    for b in range(bblk):
        o_ref[b] = y[:, b * q_pad:(b + 1) * q_pad]


# ----------------------------------------------------------------------------
# Per-step batch sizing from a VMEM budget (conservative enough for v7x).
# ----------------------------------------------------------------------------
def _pick_block_batch(n, c_in, c_out, p, q_pad, budget_bytes=16 * 2**20):
    def step_bytes(b):
        x_b = 2 * b * c_in * p * 2                      # bf16 input, double-buffered
        o_b = 2 * b * c_out * q_pad * 2                 # bf16 output, double-buffered
        w_b = 2 * 9 * c_in * c_out * 2                  # weights (tiny)
        rhs_b = 9 * c_in * b * q_pad * 2                # RHS scratch (single buffer)
        acc_b = 2 * c_out * b * q_pad * 4               # f32 acc + epilogue temps
        return x_b + o_b + w_b + rhs_b + acc_b

    bblk = 1
    while bblk < n and step_bytes(2 * bblk) <= budget_bytes:
        bblk *= 2
    return bblk


# ----------------------------------------------------------------------------
# UpsampleBLock forward.
# ----------------------------------------------------------------------------
def upsample_block_forward(x_nchw, weight, bias, up_scale):
    """x_nchw: (N, C_in, H, W); weight: (C_out, C_in, 3, 3); bias: (C_out,).

    Returns (N, C_in, H*r, W*r) matching PyTorch semantics.
    """
    N, C_in, H, W = x_nchw.shape
    C_out = weight.shape[0]
    r = up_scale
    assert C_out == C_in * r * r

    wpad = W + 2
    Q = H * wpad                          # valid output columns per image
    Qp = _round_up(Q, 128)                # lane-aligned kernel output columns
    # Every tap slice [d : d+Qp] (max d = 2*wpad + 2) must stay inside the
    # flattened padded image.  The extra Qp - Q columns read zero-padding only,
    # so they compute finite junk that is sliced off below.
    P0 = (H + 2) * wpad
    P = _round_up(max(P0, 2 * wpad + 2 + Qp), 128)

    # Spatial zero-pad (conv padding=1), flatten spatial, pad flat dim to P.
    x_pad = jnp.pad(x_nchw, ((0, 0), (0, 0), (1, 1), (1, 1)))
    x_flat = jnp.pad(x_pad.reshape(N, C_in, P0), ((0, 0), (0, 0), (0, P - P0)))
    x_flat = x_flat.astype(jnp.bfloat16)

    # weight (C_out, C_in, 3, 3) -> (C_out, 9*C_in), K index = (ky*3+kx)*C_in + ci.
    w_stacked = jnp.transpose(weight, (0, 2, 3, 1)).reshape(C_out, 9 * C_in)
    w_stacked = w_stacked.astype(jnp.bfloat16)
    b2d = bias.reshape(C_out, 1).astype(jnp.float32)

    # Batch several images per grid step (amortizes per-step overhead, weight
    # reuse, pipeline depth).  Budget re-derived per shape, fits v7x VMEM too.
    bblk = _pick_block_batch(N, C_in, C_out, P, Qp)
    N_pad = _round_up(N, bblk)
    if N_pad != N:
        x_flat = jnp.pad(x_flat, ((0, N_pad - N), (0, 0), (0, 0)))
    nsteps = N_pad // bblk

    kernel = functools.partial(_conv_mish_kernel, wpad=wpad, q_pad=Qp, bblk=bblk)

    cost = pl.CostEstimate(
        flops=2 * N_pad * C_out * 9 * C_in * Qp + 6 * N_pad * C_out * Qp,
        transcendentals=N_pad * C_out * Qp,
        bytes_accessed=(N_pad * C_in * P + 9 * C_in * C_out
                        + 2 * N_pad * C_out * Qp) * 2,
    )

    y = pl.pallas_call(
        kernel,
        out_shape=jax.ShapeDtypeStruct((N_pad, C_out, Qp), jnp.bfloat16),
        grid_spec=pltpu.PrefetchScalarGridSpec(
            num_scalar_prefetch=0,
            grid=(nsteps,),
            in_specs=[
                pl.BlockSpec((bblk, C_in, P), lambda n: (n, 0, 0)),
                pl.BlockSpec((C_out, 9 * C_in), lambda n: (0, 0)),
                pl.BlockSpec((C_out, 1), lambda n: (0, 0)),
            ],
            out_specs=pl.BlockSpec((bblk, C_out, Qp), lambda n: (n, 0, 0)),
            scratch_shapes=[pltpu.VMEM((9 * C_in, bblk * Qp), jnp.bfloat16)],
        ),
        compiler_params=pltpu.CompilerParams(
            dimension_semantics=("parallel",),
            vmem_limit_bytes=32 * 2**20),
        cost_estimate=cost,
    )(x_flat, w_stacked, b2d)

    # Glue stays in bf16: drop junk columns, pixel-shuffle rearrangement.
    y = y[:N, :, :Q].reshape(N, C_out, H, wpad)[:, :, :, :W]   # (N, C_out, H, W)
    # Pixel shuffle: out[n, c, h*r+i, w*r+j] = y[n, c*r^2 + i*r + j, h, w].
    y = y.reshape(N, C_in, r, r, H, W)
    y = jnp.transpose(y, (0, 1, 4, 2, 5, 3)).reshape(N, C_in, H * r, W * r)
    return y.astype(x_nchw.dtype)


# ----------------------------------------------------------------------------
# Pure-JAX f32 reference (for sanity checking).
# ----------------------------------------------------------------------------
def _reference(x_nchw, weight, bias, up_scale):
    y = lax.conv_general_dilated(
        x_nchw.astype(jnp.float32), weight.astype(jnp.float32),
        window_strides=(1, 1), padding=((1, 1), (1, 1)),
        dimension_numbers=("NCHW", "OIHW", "NCHW"))
    y = y + bias.reshape(1, -1, 1, 1)
    N, C_out, H, W = y.shape
    r = up_scale
    C = C_out // (r * r)
    y = y.reshape(N, C, r, r, H, W)
    y = jnp.transpose(y, (0, 1, 4, 2, 5, 3)).reshape(N, C, H * r, W * r)
    return y * jnp.tanh(jax.nn.softplus(y))


if __name__ == "__main__":
    key = jax.random.PRNGKey(0)
    k_x, k_w, k_b = jax.random.split(key, 3)

    # Small shapes consistent with the module.
    N, C_in, H, W = 2, 4, 16, 16
    up_scale = 2
    C_out = C_in * up_scale ** 2

    x = jax.random.normal(k_x, (N, C_in, H, W), dtype=jnp.float32)
    fan_in = C_in * 3 * 3
    weight = jax.random.normal(k_w, (C_out, C_in, 3, 3), dtype=jnp.float32) / jnp.sqrt(fan_in)
    bias = jax.random.normal(k_b, (C_out,), dtype=jnp.float32) * 0.1

    fwd = jax.jit(functools.partial(upsample_block_forward, up_scale=up_scale))
    out = jax.block_until_ready(fwd(x, weight, bias))

    ref = _reference(x, weight, bias, up_scale)
    assert out.shape == (N, C_in, H * up_scale, W * up_scale), out.shape
    # bf16 matmul operands + bf16 output store + approx reciprocal -> loose
    # tolerance vs the f32 reference.
    max_err = float(jnp.max(jnp.abs(out - ref)))
    assert max_err < 6e-2, max_err

    print("KERNEL_OK")
</pallas_src>

<mosaic_0001>
module attributes {stable_mosaic.version = 11 : i64} {
  func.func @_conv_mish_kernel(%arg0: i32, %arg1: memref<2x4x512xbf16, #tpu.memory_space<vmem>>, %arg2: memref<16x36xbf16, #tpu.memory_space<vmem>>, %arg3: memref<16x1xf32, #tpu.memory_space<vmem>>, %arg4: memref<2x16x384xbf16, #tpu.memory_space<vmem>>, %arg5: memref<36x768xbf16, #tpu.memory_space<vmem>>) attributes {dimension_semantics = [#tpu.dimension_semantics<parallel>], iteration_bounds = array<i64: 1>, scalar_prefetch = 0 : i64, scratch_operands = 1 : i64, tpu.core_type = #tpu.core_type<tc>, window_params = [{transform_indices = @transform_0, window_bounds = array<i64: 2, 4, 512>}, {pipeline_mode = #tpu.pipeline_mode<synchronous>, transform_indices = @transform_1, window_bounds = array<i64: 16, 36>}, {pipeline_mode = #tpu.pipeline_mode<synchronous>, transform_indices = @transform_2, window_bounds = array<i64: 16, 1>}, {transform_indices = @transform_3, window_bounds = array<i64: 2, 16, 384>}]} {
    %c0 = arith.constant 0 : index
    %c0_0 = arith.constant 0 : index
    %c0_1 = arith.constant 0 : index
    %0 = vector.load %arg1[%c0, %c0_0, %c0_1] : memref<2x4x512xbf16, #tpu.memory_space<vmem>>, vector<1x4x512xbf16>
    %1 = vector.shape_cast %0 : vector<1x4x512xbf16> to vector<4x512xbf16>
    %2 = vector.extract_strided_slice %1 {offsets = [0, 0], sizes = [4, 384], strides = [1, 1]} : vector<4x512xbf16> to vector<4x384xbf16>
    %c0_2 = arith.constant 0 : index
    %c0_3 = arith.constant 0 : index
    %3 = vector.load %arg5[%c0_2, %c0_3] : memref<36x768xbf16, #tpu.memory_space<vmem>>, vector<4x384xbf16>
    tpu.vector_store %arg5[%c0_2, %c0_3], %2 {strides = array<i32>} : memref<36x768xbf16, #tpu.memory_space<vmem>>, vector<4x384xbf16>,
    %4 = vector.extract_strided_slice %1 {offsets = [0, 1], sizes = [4, 384], strides = [1, 1]} : vector<4x512xbf16> to vector<4x384xbf16>
    %c4 = arith.constant 4 : index
    %c0_4 = arith.constant 0 : index
    %5 = vector.load %arg5[%c4, %c0_4] : memref<36x768xbf16, #tpu.memory_space<vmem>>, vector<4x384xbf16>
    tpu.vector_store %arg5[%c4, %c0_4], %4 {strides = array<i32>} : memref<36x768xbf16, #tpu.memory_space<vmem>>, vector<4x384xbf16>,
    %6 = vector.extract_strided_slice %1 {offsets = [0, 2], sizes = [4, 384], strides = [1, 1]} : vector<4x512xbf16> to vector<4x384xbf16>
    %c8 = arith.constant 8 : index
    %c0_5 = arith.constant 0 : index
    %7 = vector.load %arg5[%c8, %c0_5] : memref<36x768xbf16, #tpu.memory_space<vmem>>, vector<4x384xbf16>
    tpu.vector_store %arg5[%c8, %c0_5], %6 {strides = array<i32>} : memref<36x768xbf16, #tpu.memory_space<vmem>>, vector<4x384xbf16>,
    %8 = vector.extract_strided_slice %1 {offsets = [0, 18], sizes = [4, 384], strides = [1, 1]} : vector<4x512xbf16> to vector<4x384xbf16>
    %c12 = arith.constant 12 : index
    %c0_6 = arith.constant 0 : index
    %9 = vector.load %arg5[%c12, %c0_6] : memref<36x768xbf16, #tpu.memory_space<vmem>>, vector<4x384xbf16>
    tpu.vector_store %arg5[%c12, %c0_6], %8 {strides = array<i32>} : memref<36x768xbf16, #tpu.memory_space<vmem>>, vector<4x384xbf16>,
    %10 = vector.extract_strided_slice %1 {offsets = [0, 19], sizes = [4, 384], strides = [1, 1]} : vector<4x512xbf16> to vector<4x384xbf16>
    %c16 = arith.constant 16 : index
    %c0_7 = arith.constant 0 : index
    %11 = vector.load %arg5[%c16, %c0_7] : memref<36x768xbf16, #tpu.memory_space<vmem>>, vector<4x384xbf16>
    tpu.vector_store %arg5[%c16, %c0_7], %10 {strides = array<i32>} : memref<36x768xbf16, #tpu.memory_space<vmem>>, vector<4x384xbf16>,
    %12 = vector.extract_strided_slice %1 {offsets = [0, 20], sizes = [4, 384], strides = [1, 1]} : vector<4x512xbf16> to vector<4x384xbf16>
    %c20 = arith.constant 20 : index
    %c0_8 = arith.constant 0 : index
    %13 = vector.load %arg5[%c20, %c0_8] : memref<36x768xbf16, #tpu.memory_space<vmem>>, vector<4x384xbf16>
    tpu.vector_store %arg5[%c20, %c0_8], %12 {strides = array<i32>} : memref<36x768xbf16, #tpu.memory_space<vmem>>, vector<4x384xbf16>,
    %14 = vector.extract_strided_slice %1 {offsets = [0, 36], sizes = [4, 384], strides = [1, 1]} : vector<4x512xbf16> to vector<4x384xbf16>
    %c24 = arith.constant 24 : index
    %c0_9 = arith.constant 0 : index
    %15 = vector.load %arg5[%c24, %c0_9] : memref<36x768xbf16, #tpu.memory_space<vmem>>, vector<4x384xbf16>
    tpu.vector_store %arg5[%c24, %c0_9], %14 {strides = array<i32>} : memref<36x768xbf16, #tpu.memory_space<vmem>>, vector<4x384xbf16>,
    %16 = vector.extract_strided_slice %1 {offsets = [0, 37], sizes = [4, 384], strides = [1, 1]} : vector<4x512xbf16> to vector<4x384xbf16>
    %c28 = arith.constant 28 : index
    %c0_10 = arith.constant 0 : index
    %17 = vector.load %arg5[%c28, %c0_10] : memref<36x768xbf16, #tpu.memory_space<vmem>>, vector<4x384xbf16>
    tpu.vector_store %arg5[%c28, %c0_10], %16 {strides = array<i32>} : memref<36x768xbf16, #tpu.memory_space<vmem>>, vector<4x384xbf16>,
    %18 = vector.extract_strided_slice %1 {offsets = [0, 38], sizes = [4, 384], strides = [1, 1]} : vector<4x512xbf16> to vector<4x384xbf16>
    %c32 = arith.constant 32 : index
    %c0_11 = arith.constant 0 : index
    %19 = vector.load %arg5[%c32, %c0_11] : memref<36x768xbf16, #tpu.memory_space<vmem>>, vector<4x384xbf16>
    tpu.vector_store %arg5[%c32, %c0_11], %18 {strides = array<i32>} : memref<36x768xbf16, #tpu.memory_space<vmem>>, vector<4x384xbf16>,
    %c1 = arith.constant 1 : index
    %c0_12 = arith.constant 0 : index
    %c0_13 = arith.constant 0 : index
    %20 = vector.load %arg1[%c1, %c0_12, %c0_13] : memref<2x4x512xbf16, #tpu.memory_space<vmem>>, vector<1x4x512xbf16>
    %21 = vector.shape_cast %20 : vector<1x4x512xbf16> to vector<4x512xbf16>
    %22 = vector.extract_strided_slice %21 {offsets = [0, 0], sizes = [4, 384], strides = [1, 1]} : vector<4x512xbf16> to vector<4x384xbf16>
    %c0_14 = arith.constant 0 : index
    %c384 = arith.constant 384 : index
    %23 = vector.load %arg5[%c0_14, %c384] : memref<36x768xbf16, #tpu.memory_space<vmem>>, vector<4x384xbf16>
    tpu.vector_store %arg5[%c0_14, %c384], %22 {strides = array<i32>} : memref<36x768xbf16, #tpu.memory_space<vmem>>, vector<4x384xbf16>,
    %24 = vector.extract_strided_slice %21 {offsets = [0, 1], sizes = [4, 384], strides = [1, 1]} : vector<4x512xbf16> to vector<4x384xbf16>
    %c4_15 = arith.constant 4 : index
    %c384_16 = arith.constant 384 : index
    %25 = vector.load %arg5[%c4_15, %c384_16] : memref<36x768xbf16, #tpu.memory_space<vmem>>, vector<4x384xbf16>
    tpu.vector_store %arg5[%c4_15, %c384_16], %24 {strides = array<i32>} : memref<36x768xbf16, #tpu.memory_space<vmem>>, vector<4x384xbf16>,
    %26 = vector.extract_strided_slice %21 {offsets = [0, 2], sizes = [4, 384], strides = [1, 1]} : vector<4x512xbf16> to vector<4x384xbf16>
    %c8_17 = arith.constant 8 : index
    %c384_18 = arith.constant 384 : index
    %27 = vector.load %arg5[%c8_17, %c384_18] : memref<36x768xbf16, #tpu.memory_space<vmem>>, vector<4x384xbf16>
    tpu.vector_store %arg5[%c8_17, %c384_18], %26 {strides = array<i32>} : memref<36x768xbf16, #tpu.memory_space<vmem>>, vector<4x384xbf16>,
    %28 = vector.extract_strided_slice %21 {offsets = [0, 18], sizes = [4, 384], strides = [1, 1]} : vector<4x512xbf16> to vector<4x384xbf16>
    %c12_19 = arith.constant 12 : index
    %c384_20 = arith.constant 384 : index
    %29 = vector.load %arg5[%c12_19, %c384_20] : memref<36x768xbf16, #tpu.memory_space<vmem>>, vector<4x384xbf16>
    tpu.vector_store %arg5[%c12_19, %c384_20], %28 {strides = array<i32>} : memref<36x768xbf16, #tpu.memory_space<vmem>>, vector<4x384xbf16>,
    %30 = vector.extract_strided_slice %21 {offsets = [0, 19], sizes = [4, 384], strides = [1, 1]} : vector<4x512xbf16> to vector<4x384xbf16>
    %c16_21 = arith.constant 16 : index
    %c384_22 = arith.constant 384 : index
    %31 = vector.load %arg5[%c16_21, %c384_22] : memref<36x768xbf16, #tpu.memory_space<vmem>>, vector<4x384xbf16>
    tpu.vector_store %arg5[%c16_21, %c384_22], %30 {strides = array<i32>} : memref<36x768xbf16, #tpu.memory_space<vmem>>, vector<4x384xbf16>,
    %32 = vector.extract_strided_slice %21 {offsets = [0, 20], sizes = [4, 384], strides = [1, 1]} : vector<4x512xbf16> to vector<4x384xbf16>
    %c20_23 = arith.constant 20 : index
    %c384_24 = arith.constant 384 : index
    %33 = vector.load %arg5[%c20_23, %c384_24] : memref<36x768xbf16, #tpu.memory_space<vmem>>, vector<4x384xbf16>
    tpu.vector_store %arg5[%c20_23, %c384_24], %32 {strides = array<i32>} : memref<36x768xbf16, #tpu.memory_space<vmem>>, vector<4x384xbf16>,
    %34 = vector.extract_strided_slice %21 {offsets = [0, 36], sizes = [4, 384], strides = [1, 1]} : vector<4x512xbf16> to vector<4x384xbf16>
    %c24_25 = arith.constant 24 : index
    %c384_26 = arith.constant 384 : index
    %35 = vector.load %arg5[%c24_25, %c384_26] : memref<36x768xbf16, #tpu.memory_space<vmem>>, vector<4x384xbf16>
    tpu.vector_store %arg5[%c24_25, %c384_26], %34 {strides = array<i32>} : memref<36x768xbf16, #tpu.memory_space<vmem>>, vector<4x384xbf16>,
    %36 = vector.extract_strided_slice %21 {offsets = [0, 37], sizes = [4, 384], strides = [1, 1]} : vector<4x512xbf16> to vector<4x384xbf16>
    %c28_27 = arith.constant 28 : index
    %c384_28 = arith.constant 384 : index
    %37 = vector.load %arg5[%c28_27, %c384_28] : memref<36x768xbf16, #tpu.memory_space<vmem>>, vector<4x384xbf16>
    tpu.vector_store %arg5[%c28_27, %c384_28], %36 {strides = array<i32>} : memref<36x768xbf16, #tpu.memory_space<vmem>>, vector<4x384xbf16>,
    %38 = vector.extract_strided_slice %21 {offsets = [0, 38], sizes = [4, 384], strides = [1, 1]} : vector<4x512xbf16> to vector<4x384xbf16>
    %c32_29 = arith.constant 32 : index
    %c384_30 = arith.constant 384 : index
    %39 = vector.load %arg5[%c32_29, %c384_30] : memref<36x768xbf16, #tpu.memory_space<vmem>>, vector<4x384xbf16>
    tpu.vector_store %arg5[%c32_29, %c384_30], %38 {strides = array<i32>} : memref<36x768xbf16, #tpu.memory_space<vmem>>, vector<4x384xbf16>,
    %c0_31 = arith.constant 0 : index
    %c0_32 = arith.constant 0 : index
    %40 = vector.load %arg2[%c0_31, %c0_32] : memref<16x36xbf16, #tpu.memory_space<vmem>>, vector<16x36xbf16>
    %c0_33 = arith.constant 0 : index
    %c0_34 = arith.constant 0 : index
    %41 = vector.load %arg5[%c0_33, %c0_34] : memref<36x768xbf16, #tpu.memory_space<vmem>>, vector<36x768xbf16>
    %cst = arith.constant dense<0.000000e+00> : vector<16x768xf32>
    %42 = tpu.matmul %40, %41, %cst {dimension_numbers = #tpu.dot_dimension_numbers<[1], [0], [0], [1], [0, 0, 1, 1], [], []>} : vector<16x36xbf16>, vector<36x768xbf16>, vector<16x768xf32> -> vector<16x768xf32>
    %c0_35 = arith.constant 0 : index
    %c0_36 = arith.constant 0 : index
    %43 = vector.load %arg3[%c0_35, %c0_36] : memref<16x1xf32, #tpu.memory_space<vmem>>, vector<16x1xf32>
    %44 = vector.broadcast %43 : vector<16x1xf32> to vector<16x768xf32>
    %45 = arith.addf %42, %44 : vector<16x768xf32>
    %cst_37 = arith.constant 3.000000e+01 : f32
    %46 = vector.broadcast %cst_37 : f32 to vector<16x768xf32>
    %47 = arith.minimumf %45, %46 : vector<16x768xf32>
    %48 = math.exp %47 : vector<16x768xf32>
    %cst_38 = arith.constant 2.000000e+00 : f32
    %49 = vector.broadcast %cst_38 : f32 to vector<16x768xf32>
    %50 = arith.addf %48, %49 : vector<16x768xf32>
    %51 = arith.mulf %48, %50 : vector<16x768xf32>
    %52 = arith.mulf %45, %51 : vector<16x768xf32>
    %cst_39 = arith.constant 2.000000e+00 : f32
    %53 = vector.broadcast %cst_39 : f32 to vector<16x768xf32>
    %54 = arith.addf %51, %53 : vector<16x768xf32>
    %55 = tpu.reciprocal %54 {approx = true} : vector<16x768xf32> -> vector<16x768xf32>
    %56 = arith.mulf %52, %55 : vector<16x768xf32>
    %57 = arith.truncf %56 : vector<16x768xf32> to vector<16x768xbf16>
    %58 = vector.extract_strided_slice %57 {offsets = [0, 0], sizes = [16, 384], strides = [1, 1]} : vector<16x768xbf16> to vector<16x384xbf16>
    %c0_40 = arith.constant 0 : index
    %c0_41 = arith.constant 0 : index
    %c0_42 = arith.constant 0 : index
    %59 = vector.load %arg4[%c0_40, %c0_41, %c0_42] : memref<2x16x384xbf16, #tpu.memory_space<vmem>>, vector<1x16x384xbf16>
    %60 = vector.shape_cast %59 : vector<1x16x384xbf16> to vector<16x384xbf16>
    %61 = vector.shape_cast %58 : vector<16x384xbf16> to vector<1x16x384xbf16>
    tpu.vector_store %arg4[%c0_40, %c0_41, %c0_42], %61 {strides = array<i32>} : memref<2x16x384xbf16, #tpu.memory_space<vmem>>, vector<1x16x384xbf16>,
    %62 = vector.extract_strided_slice %57 {offsets = [0, 384], sizes = [16, 384], strides = [1, 1]} : vector<16x768xbf16> to vector<16x384xbf16>
    %c1_43 = arith.constant 1 : index
    %c0_44 = arith.constant 0 : index
    %c0_45 = arith.constant 0 : index
    %63 = vector.load %arg4[%c1_43, %c0_44, %c0_45] : memref<2x16x384xbf16, #tpu.memory_space<vmem>>, vector<1x16x384xbf16>
    %64 = vector.shape_cast %63 : vector<1x16x384xbf16> to vector<16x384xbf16>
    %65 = vector.shape_cast %62 : vector<16x384xbf16> to vector<1x16x384xbf16>
    tpu.vector_store %arg4[%c1_43, %c0_44, %c0_45], %65 {strides = array<i32>} : memref<2x16x384xbf16, #tpu.memory_space<vmem>>, vector<1x16x384xbf16>,
    return
  }
  func.func @transform_0(%arg0: i32) -> (i32, i32, i32) {
    %c0_i32 = arith.constant 0 : i32
    %c0_i32_0 = arith.constant 0 : i32
    %c0_i32_1 = arith.constant 0 : i32
    return %arg0, %c0_i32, %c0_i32_0 : i32, i32, i32
  }
  func.func @transform_1(%arg0: i32) -> (i32, i32) {
    %c0_i32 = arith.constant 0 : i32
    %c0_i32_0 = arith.constant 0 : i32
    %c0_i32_1 = arith.constant 0 : i32
    return %c0_i32, %c0_i32_0 : i32, i32
  }
  func.func @transform_2(%arg0: i32) -> (i32, i32) {
    %c0_i32 = arith.constant 0 : i32
    %c0_i32_0 = arith.constant 0 : i32
    %c0_i32_1 = arith.constant 0 : i32
    return %c0_i32, %c0_i32_0 : i32, i32
  }
  func.func @transform_3(%arg0: i32) -> (i32, i32, i32) {
    %c0_i32 = arith.constant 0 : i32
    %c0_i32_0 = arith.constant 0 : i32
    %c0_i32_1 = arith.constant 0 : i32
    return %arg0, %c0_i32, %c0_i32_0 : i32, i32, i32
  }
}

</mosaic_0001>

<bundles_post_ra>
// kernel: upsample_block_forward.1
= control target key start
LH: loop header
LB: loop body
LE: loop exit
PB: predicated region body
PF: predicated region fallthrough
CT: control target
= control target key end

     0   :  { %s831_s14 = smov 127   ;;  %s832_s15 = smov 126   ;;  %vm36_vm0 = vcmask 1043456   ;;  %vm38_vm1 = vcmask 1039360   ;;  %vm57_vm2 = vcmask 1031168   ;;  %vm77_vm3 = vcmask 900096   ;;  %s1058_s0 = inlined_call_operand.vmem [shape: bf16[2,4,512], index: 0, kind: input, shape index: {}]   ;;  %s1059_s1 = inlined_call_operand.vmem [shape: bf16[16,36], index: 1, kind: input, shape index: {}]   ;;  %s1060_s2 = inlined_call_operand.vmem [shape: f32[16,1], index: 2, kind: input, shape index: {}]   ;;  %s1061_s3 = inlined_call_operand.vmem [shape: bf16[2,16,384], index: 3, kind: output, shape index: {}]  }
   0x1   :  { %v15_v0 = vld [vmem:[%s1058_s0] sm:$0xff]  ;;  %s833_s16 = smov 110   ;;  %s834_s17 = smov 109   ;;  %v696_v17 = vld [vmem:[%s1058_s0 + $0x8] sm:$0xff]  ;;  %vm116_vm4 = vcmask 883712   ;;  %vm96_vm5 = vcmask 891904  }
   0x2   :  { %17 = vst [vmem:[#allocation1] ss:$2 sm:$0xff] %v15_v0  ;;  %s835_s18 = smov 108   ;;  %s836_s19 = smov 92   ;;  %vm135_vm6 = vcmask 752640   ;;  %vm155_vm7 = vcmask 744448  }
   0x3   :  { %s837_s20 = smov 91   ;;  %s838_s23 = smov 90   ;;  %vm174_vm8 = vcmask 736256   ;;  %vm452_vm9 = vcmask 1041408   ;;  %vm448_vm10 = vcmask 293888  }
   0x9   :  { %v18_v1 = vld.sshfl [vmem:[#allocation1] sm:$0xff pattern:$0x75643120]  ;;  %v19_v2 = vld.sshfl [vmem:[#allocation1 + $0x8] sm:$0xff pattern:$0x75643120] }
   0xa   :  { %25 = vst [vmem:[#allocation1 + $0x1] ss:$2 sm:$0xff] %v15_v0 }
   0xb   :  { %22 = vst [vmem:[#allocation2] sm:$0x33] %v18_v1 }
   0xc   :  { %23 = vst [vmem:[#allocation2 + $0x8] sm:$0x3] %v19_v2 }
  0x11   :  { %v26_v3 = vld.sshfl [vmem:[#allocation1] sm:$0xff pattern:$0x75643120]  ;;  %v28_v4 = vld.sshfl [vmem:[#allocation1 + $0x8] sm:$0xff pattern:$0x75643120] }
  0x12   :  { %30 = vrot.lane.b32.xlu0 %v26_v3, %s831_s14  ;;  %45 = vst [vmem:[#allocation1] ss:$2 sm:$0xff] %v15_v0  ;;  %32 = vrot.lane.b32.xlu1 %v28_v4, %s831_s14 }
  0x19   :  { %v48_v5 = vld.sshfl [vmem:[#allocation1 + $0x8] sm:$0xff pattern:$0x75643120]  ;;  %v46_v6 = vld.sshfl [vmem:[#allocation1] sm:$0xff pattern:$0x75643120] }
  0x1a   :  { %52 = vrot.lane.b32.xlu0 %v48_v5, %s832_s15  ;;  %65 = vst [vmem:[#allocation1 + $0x1] ss:$2 sm:$0xff] %v15_v0  ;;  %50 = vrot.lane.b32.xlu2 %v46_v6, %s832_s15 }
  0x21   :  { %v66_v7 = vld.sshfl [vmem:[#allocation1] sm:$0xff pattern:$0x75643120]  ;;  %v68_v8 = vld.sshfl [vmem:[#allocation1 + $0x8] sm:$0xff pattern:$0x75643120] }
  0x22   :  { %84 = vst [vmem:[#allocation1] ss:$2 sm:$0xff] %v15_v0  ;;  %70 = vrot.lane.b32.xlu1 %v66_v7, %s833_s16  ;;  %72 = vrot.lane.b32.xlu2 %v68_v8, %s833_s16 }
  0x29   :  { %v85_v9 = vld.sshfl [vmem:[#allocation1] sm:$0xff pattern:$0x75643120]  ;;  %v87_v10 = vld.sshfl [vmem:[#allocation1 + $0x8] sm:$0xff pattern:$0x75643120] }
  0x2a   :  { %104 = vst [vmem:[#allocation1 + $0x1] ss:$2 sm:$0xff] %v15_v0  ;;  %89 = vrot.lane.b32.xlu1 %v85_v9, %s834_s17 }
  0x31   :  { %v105_v11 = vld.sshfl [vmem:[#allocation1] sm:$0xff pattern:$0x75643120]  ;;  %v107_v12 = vld.sshfl [vmem:[#allocation1 + $0x8] sm:$0xff pattern:$0x75643120] }
  0x32   :  { %123 = vst [vmem:[#allocation1] ss:$2 sm:$0xff] %v15_v0  ;;  %91 = vrot.lane.b32.xlu1 %v87_v10, %s834_s17  ;;  %109 = vrot.lane.b32.xlu2 %v105_v11, %s835_s18 }
  0x39   :  { %v124_v13 = vld.sshfl [vmem:[#allocation1] sm:$0xff pattern:$0x75643120]  ;;  %v126_v14 = vld.sshfl [vmem:[#allocation1 + $0x8] sm:$0xff pattern:$0x75643120] }
  0x3a   :  { %128 = vrot.lane.b32.xlu0 %v124_v13, %s836_s19  ;;  %143 = vst [vmem:[#allocation1 + $0x1] ss:$2 sm:$0xff] %v15_v0  ;;  %130 = vrot.lane.b32.xlu1 %v126_v14, %s836_s19 }
  0x3b   :  { %111 = vrot.lane.b32.xlu2 %v107_v12, %s835_s18 }
  0x41   :  { %v146_v15 = vld.sshfl [vmem:[#allocation1 + $0x8] sm:$0xff pattern:$0x75643120]  ;;  %v144_v16 = vld.sshfl [vmem:[#allocation1] sm:$0xff pattern:$0x75643120] }
  0x42   :  { %150 = vrot.lane.b32.xlu0 %v146_v15, %s837_s20  ;;  %162 = vst [vmem:[#allocation1] ss:$2 sm:$0xff] %v15_v0 }
  0x43   :  { %148 = vrot.lane.b32.xlu2 %v144_v16, %s837_s20 }
  0x49   :  { %v163_v18 = vld.sshfl [vmem:[#allocation1] sm:$0xff pattern:$0x75643120]  ;;  %v165_v19 = vld.sshfl [vmem:[#allocation1 + $0x8] sm:$0xff pattern:$0x75643120] }
  0x4a   :  { %167 = vrot.lane.b32.xlu0 %v163_v18, %s838_s23  ;;  %184 = vst [vmem:[#allocation1] ss:$2 sm:$0xff] %v696_v17 }
  0x51   :  { %v185_v20 = vld.sshfl [vmem:[#allocation1] sm:$0xff pattern:$0x75643120]  ;;  %v186_v21 = vld.sshfl [vmem:[#allocation1 + $0x8] sm:$0xff pattern:$0x75643120] }
  0x52   :  { %169 = vrot.lane.b32.xlu0 %v165_v19, %s838_s23  ;;  %192 = vst [vmem:[#allocation1 + $0x1] ss:$2 sm:$0xff] %v696_v17 }
  0x53   :  { %189 = vst [vmem:[#allocation2 + $0xc] sm:$0x33] %v185_v20 }
  0x54   :  { %190 = vst [vmem:[#allocation2 + $0x14] sm:$0x3] %v186_v21 }
  0x59   :  { %v882_v22 = vld.sshfl [vmem:[#allocation1] sm:$0xff pattern:$0x75643120]  ;;  %v195_v23 = vld.sshfl [vmem:[#allocation1 + $0x8] sm:$0xff pattern:$0x75643120] }
  0x5a   :  { %210 = vst [vmem:[#allocation1] ss:$2 sm:$0xff] %v696_v17 }
  0x61   :  { %v211_v24 = vld.sshfl [vmem:[#allocation1] sm:$0xff pattern:$0x75643120]  ;;  %v884_v25 = vld.sshfl [vmem:[#allocation1 + $0x8] sm:$0xff pattern:$0x75643120] }
  0x62   :  { %229 = vst [vmem:[#allocation1 + $0x1] ss:$2 sm:$0xff] %v696_v17 }
  0x69   :  { %v230_v26 = vld.sshfl [vmem:[#allocation1] sm:$0xff pattern:$0x75643120]  ;;  %v886_v27 = vld.sshfl [vmem:[#allocation1 + $0x8] sm:$0xff pattern:$0x75643120] }
  0x6a   :  { %247 = vst [vmem:[#allocation1] ss:$2 sm:$0xff] %v696_v17 }
  0x71   :  { %v248_v28 = vld.sshfl [vmem:[#allocation1] sm:$0xff pattern:$0x75643120]  ;;  %v250_v29 = vld.sshfl [vmem:[#allocation1 + $0x8] sm:$0xff pattern:$0x75643120] }
  0x72   :  { %252 = vrot.lane.b32.xlu0 %v248_v28, %s834_s17  ;;  %254 = vrot.lane.b32.xlu1 %v250_v29, %s834_s17  ;;  %266 = vst [vmem:[#allocation1 + $0x1] ss:$2 sm:$0xff] %v696_v17 }
  0x74   :  { %v51_v34 = vpop.permute.xlu2 %50 }
  0x75   :  { %v54_v44 = vrot.slane %v51_v34, 4 }
  0x79   :  { %v269_v30 = vld.sshfl [vmem:[#allocation1 + $0x8] sm:$0xff pattern:$0x75643120]  ;;  %v267_v31 = vld.sshfl [vmem:[#allocation1] sm:$0xff pattern:$0x75643120] }
  0x7a   :  { %273 = vrot.lane.b32.xlu0 %v269_v30, %s835_s18  ;;  %284 = vst [vmem:[#allocation1] ss:$2 sm:$0xff] %v696_v17  ;;  %271 = vrot.lane.b32.xlu2 %v267_v31, %s835_s18 }
  0x7c   :  { %v73_v47 = vpop.permute.xlu2 %72 }
  0x7d   :  { %v75_v48 = vrot.slane %v73_v47, 4 }
  0x7f   :  { %v79_v52 = vsel %vm77_vm3, %v73_v47, %v75_v48 }
  0x80   :  { %83 = vst [vmem:[#allocation2 + $0x20] sm:$0xc] %v79_v52  ;;  %v936_v52 = vld [vmem:[%s1059_s1] sm:$0xff] }
  0x81   :  { %v285_v32 = vld.sshfl [vmem:[#allocation1] sm:$0xff pattern:$0x75643120]  ;;  %v287_v33 = vld.sshfl [vmem:[#allocation1 + $0x8] sm:$0xff pattern:$0x75643120] }
  0x82   :  { %289 = vrot.lane.b32.xlu1 %v285_v32, %s836_s19  ;;  %303 = vst [vmem:[#allocation1 + $0x1] ss:$2 sm:$0xff] %v696_v17  ;;  %291 = vrot.lane.b32.xlu2 %v287_v33, %s836_s19 }
  0x84   :  { %v31_v35 = vpop.permute.xlu0 %30  ;;  %v33_v36 = vpop.permute.xlu1 %32 }
  0x85   :  { %v34_v37 = vrot.slane %v31_v35, 4  ;;  %v35_v38 = vrot.slane %v33_v36, 4 }
  0x87   :  { %v37_v39 = vsel %vm36_vm0, %v34_v37, %v35_v38  ;;  %v40_v40 = vsel %vm38_vm1, %v33_v36, %v35_v38 }
  0x88   :  { %v39_v41 = vsel %vm38_vm1, %v31_v35, %v37_v39  ;;  %44 = vst [vmem:[#allocation2 + $0x8] sm:$0xc] %v40_v40 }
  0x89   :  { %v306_v42 = vld.sshfl [vmem:[#allocation1 + $0x8] sm:$0xff pattern:$0x75643120]  ;;  %v304_v43 = vld.sshfl [vmem:[#allocation1] sm:$0xff pattern:$0x75643120] }
  0x8a   :  { %310 = vrot.lane.b32.xlu1 %v306_v42, %s837_s20  ;;  %308 = vrot.lane.b32.xlu0 %v304_v43, %s837_s20  ;;  %321 = vst [vmem:[#allocation1] ss:$2 sm:$0xff] %v696_v17 }
  0x8b   :  { %43 = vst [vmem:[#allocation2] sm:$0xcc] %v39_v41 }
  0x8c   :  { %v53_v45 = vpop.permute.xlu0 %52  ;;  %v110_v59 = vpop.permute.xlu2 %109 }
  0x8d   :  { %v55_v46 = vrot.slane %v53_v45, 4  ;;  %v113_v61 = vrot.slane %v110_v59, 4 }
  0x8f   :  { %v59_v49 = vsel %vm57_vm2, %v53_v45, %v55_v46  ;;  %v56_v50 = vsel %vm36_vm0, %v54_v44, %v55_v46 }
  0x90   :  { %63 = vst [vmem:[#allocation2 + $0x20] sm:$0x3] %v59_v49  ;;  %v58_v51 = vsel %vm57_vm2, %v51_v34, %v56_v50 }
  0x91   :  { %v322_v53 = vld.sshfl [vmem:[#allocation1] sm:$0xff pattern:$0x75643120]  ;;  %v324_v54 = vld.sshfl [vmem:[#allocation1 + $0x8] sm:$0xff pattern:$0x75643120] }
  0x92   :  { %326 = vrot.lane.b32.xlu1 %v322_v53, %s838_s23  ;;  %199 = vrot.lane.b32.xlu0 %v195_v23, %s831_s14  ;;  %62 = vst [vmem:[#allocation2 + $0x18] sm:$0x33] %v58_v51  ;;  %v703_v44 = vld [vmem:[#allocation2] sm:$0xf]  ;;  %v760_v46 = vld [vmem:[#allocation2 + $0x4] sm:$0xf] }
  0x93   :  { %328 = vrot.lane.b32.xlu2 %v324_v54, %s838_s23 }
  0x94   :  { %v71_v55 = vpop.permute.xlu1 %70 }
  0x95   :  { %v74_v56 = vrot.slane %v71_v55, 4  ;;  %v112_v62 = vpop.permute.xlu2 %111 }
  0x96   :  { %v114_v63 = vrot.slane %v112_v62, 4 }
  0x97   :  { %v76_v57 = vsel %vm36_vm0, %v74_v56, %v75_v48 }
  0x98   :  { %v78_v58 = vsel %vm77_vm3, %v71_v55, %v76_v57  ;;  %v115_v1 = vsel %vm36_vm0, %v113_v61, %v114_v63  ;;  %v118_v2 = vsel %vm116_vm4, %v112_v62, %v114_v63 }
  0x99   :  { %82 = vst [vmem:[#allocation2 + $0x18] sm:$0xcc] %v78_v58  ;;  %v117_v4 = vsel %vm116_vm4, %v110_v59, %v115_v1 }
  0x9a   :  { %215 = vrot.lane.b32.xlu1 %v211_v24, %s832_s15  ;;  %234 = vrot.lane.b32.xlu0 %v230_v26, %s833_s16  ;;  %122 = vst [vmem:[#allocation2 + $0x38] sm:$0xc] %v118_v2 }
  0x9b   :  { %197 = vrot.lane.b32.xlu2 %v882_v22, %s831_s14  ;;  %121 = vst [vmem:[#allocation2 + $0x30] sm:$0xcc] %v117_v4 }
  0x9c   :  { %v90_v60 = vpop.permute.xlu1 %89 }
  0x9d   :  { %v93_v0 = vrot.slane %v90_v60, 4  ;;  %v149_v16 = vpop.permute.xlu2 %148 }
  0x9e   :  { %v152_v17 = vrot.slane %v149_v16, 4 }
  0xa0   :  { %v763_v45 = vld [vmem:[#allocation2 + $0x14] sm:$0xf0]  ;;  %v705_v47 = vld [vmem:[#allocation2 + $0x18] sm:$0xf0] }
  0xa1   :  { %v704_v48 = vor.u32 %v763_v45, %v703_v44  ;;  %v708_v49 = vor.u32 %v760_v46, %v705_v47 }
  0xa2   :  { %236 = vrot.lane.b32.xlu1 %v886_v27, %s833_s16 }
  0xa3   :  { %217 = vrot.lane.b32.xlu2 %v884_v25, %s832_s15 }
  0xa4   :  { %v92_v3 = vpop.permute.xlu1 %91 }
  0xa5   :  { %v94_v5 = vrot.slane %v92_v3, 4 }
  0xa7   :  { %v95_v6 = vsel %vm36_vm0, %v93_v0, %v94_v5  ;;  %v98_v7 = vsel %vm96_vm5, %v92_v3, %v94_v5 }
  0xa8   :  { %v97_v8 = vsel %vm96_vm5, %v90_v60, %v95_v6  ;;  %102 = vst [vmem:[#allocation2 + $0x38] sm:$0x3] %v98_v7  ;;  %v839_v6 = vmov 0   ;;  %v357_v7 = vld [vmem:[%s1060_s2 + $0x8] sm:$0xff] }
  0xa9   :  { %101 = vst [vmem:[#allocation2 + $0x30] sm:$0x33] %v97_v8  ;;  %782 = vset.pattern.permute.xlu0 %v839_v6  ;;  %781 = vset.pattern.permute.xlu2 %v839_v6 }
  0xaa   :  { %365 = vperm.xlu0 %782, %v357_v7  }
  0xac   :  { %v129_v9 = vpop.permute.xlu0 %128  ;;  %v131_v10 = vpop.permute.xlu1 %130 }
  0xad   :  { %v132_v11 = vrot.slane %v129_v9, 4  ;;  %v133_v12 = vrot.slane %v131_v10, 4 }
  0xaf   :  { %v134_v13 = vsel %vm36_vm0, %v132_v11, %v133_v12  ;;  %v137_v14 = vsel %vm135_vm6, %v131_v10, %v133_v12 }
  0xb0   :  { %v136_v15 = vsel %vm135_vm6, %v129_v9, %v134_v13  ;;  %141 = vst [vmem:[#allocation2 + $0x50] sm:$0x3] %v137_v14  ;;  %v727_v33 = vld [vmem:[#allocation2 + $0x30] sm:$0xf]  ;;  %v766_v37 = vld [vmem:[#allocation2 + $0x34] sm:$0xf] }
  0xb1   :  { %140 = vst [vmem:[#allocation2 + $0x48] sm:$0x33] %v136_v15 }
  0xb4   :  { %v151_v18 = vpop.permute.xlu0 %150 }
  0xb5   :  { %v153_v19 = vrot.slane %v151_v18, 4 }
  0xb7   :  { %v157_v20 = vsel %vm155_vm7, %v151_v18, %v153_v19  ;;  %v154_v21 = vsel %vm36_vm0, %v152_v17, %v153_v19 }
  0xb8   :  { %161 = vst [vmem:[#allocation2 + $0x50] sm:$0xc] %v157_v20  ;;  %v156_v22 = vsel %vm155_vm7, %v149_v16, %v154_v21 }
  0xb9   :  { %160 = vst [vmem:[#allocation2 + $0x48] sm:$0xcc] %v156_v22 }
  0xbc   :  { %v168_v23 = vpop.permute.xlu0 %167 }
  0xbd   :  { %v171_v24 = vrot.slane %v168_v23, 4 }
  0xc0   :  { %v769_v36 = vld [vmem:[#allocation2 + $0x44] sm:$0xf0]  ;;  %v729_v38 = vld [vmem:[#allocation2 + $0x48] sm:$0xf0] }
  0xc1   :  { %v728_v42 = vor.u32 %v769_v36, %v727_v33  ;;  %v732_v43 = vor.u32 %v766_v37, %v729_v38 }
  0xc4   :  { %v170_v25 = vpop.permute.xlu0 %169 }
  0xc5   :  { %v172_v26 = vrot.slane %v170_v25, 4 }
  0xc7   :  { %v173_v27 = vsel %vm36_vm0, %v171_v24, %v172_v26  ;;  %v176_v28 = vsel %vm174_vm8, %v170_v25, %v172_v26 }
  0xc8   :  { %v175_v29 = vsel %vm174_vm8, %v168_v23, %v173_v27  ;;  %180 = vst [vmem:[#allocation2 + $0x68] sm:$0x3] %v176_v28  ;;  %v356_v28 = vld [vmem:[%s1060_s2] sm:$0xff] }
  0xc9   :  { %179 = vst [vmem:[#allocation2 + $0x60] sm:$0x33] %v175_v29  ;;  %360 = vperm.xlu2 %781, %v356_v28  }
  0xd0   :  { %v353_v30 = vld [vmem:[#allocation2 + $0x60] sm:$0x33] }
  0xd1   :  { %v412_v31 = vunpack.c.l.b16 %v353_v30  ;;  %v413_v32 = vunpack.c.h.b16 %v353_v30 }
  0xd3   :  { %v430_v34 = vpack.c.b16 %v412_v31, %v412_v31  ;;  %v431_v35 = vpack.c.b16 %v413_v32, %v413_v32 }
  0xd4   :  { %v272_v39 = vpop.permute.xlu2 %271 }
  0xd5   :  { %v454_v40 = vsel %vm452_vm9, %v430_v34, 0  ;;  %v457_v41 = vsel %vm452_vm9, %v431_v35, 0  ;;  %v275_v61 = vrot.slane %v272_v39, 4 }
  0xd6   :  { %476 = vmatpush.bf16.msra.mxu0 %v454_v40  ;;  %490 = vmatpush.bf16.msra.mxu1 %v457_v41 }
  0xda   :  { %477 = vmatpush.bf16.msra.mxu0 %v728_v42  ;;  %491 = vmatpush.bf16.msra.mxu1 %v732_v43 }
  0xdc   :  { %v292_v50 = vpop.permute.xlu2 %291 }
  0xdd   :  { %v294_v51 = vrot.slane %v292_v50, 4 }
  0xde   :  { %478 = vmatpush.bf16.msra.mxu0 %v704_v48  ;;  %492 = vmatpush.bf16.msra.mxu1 %v708_v49 }
  0xdf   :  { %v297_v53 = vsel %vm135_vm6, %v292_v50, %v294_v51 }
  0xe0   :  { %301 = vst [vmem:[#allocation2 + $0x5c] sm:$0x3] %v297_v53  ;;  %v770_v53 = vld [vmem:[#allocation2 + $0x4c] sm:$0xf0] }
  0xe1   :  { %749 = vmatmul.msk.bf16.vlgmr.msra.gmra.mxu0 %vm448_vm10, %v936_v52  ;;  %750 = vmatmul.msk.bf16.vlgmr.msra.gmra.mxu1 %vm448_vm10, %v936_v52 }
  0xe4   :  { %v253_v54 = vpop.permute.xlu0 %252  ;;  %v255_v55 = vpop.permute.xlu1 %254 }
  0xe5   :  { %v256_v56 = vrot.slane %v253_v54, 4  ;;  %v257_v57 = vrot.slane %v255_v55, 4 }
  0xe7   :  { %v258_v58 = vsel %vm36_vm0, %v256_v56, %v257_v57  ;;  %v260_v59 = vsel %vm96_vm5, %v255_v55, %v257_v57 }
  0xe8   :  { %v259_v60 = vsel %vm96_vm5, %v253_v54, %v258_v58  ;;  %264 = vst [vmem:[#allocation2 + $0x44] sm:$0x3] %v260_v59 }
  0xe9   :  { %263 = vst [vmem:[#allocation2 + $0x3c] sm:$0x33] %v259_v60 }
  0xec   :  { %v274_v62 = vpop.permute.xlu0 %273 }
  0xed   :  { %v276_v63 = vrot.slane %v274_v62, 4  ;;  %v329_v0 = vpop.permute.xlu2 %328 }
  0xee   :  { %v331_v1 = vrot.slane %v329_v0, 4 }
  0xef   :  { %v279_v2 = vsel %vm116_vm4, %v274_v62, %v276_v63  ;;  %v277_v3 = vsel %vm36_vm0, %v275_v61, %v276_v63 }
  0xf0   :  { %283 = vst [vmem:[#allocation2 + $0x44] sm:$0xc] %v279_v2  ;;  %v278_v4 = vsel %vm116_vm4, %v272_v39, %v277_v3  ;;  %v334_v5 = vsel %vm174_vm8, %v329_v0, %v331_v1 }
  0xf1   :  { %282 = vst [vmem:[#allocation2 + $0x3c] sm:$0xcc] %v278_v4 }
  0xf2   :  { %338 = vst [vmem:[#allocation2 + $0x74] sm:$0x3] %v334_v5 }
  0xf4   :  { %v290_v8 = vpop.permute.xlu1 %289 }
  0xf5   :  { %v293_v9 = vrot.slane %v290_v8, 4  ;;  %v198_v10 = vpop.permute.xlu2 %197 }
  0xf6   :  { %v201_v23 = vrot.slane %v198_v10, 4 }
  0xf7   :  { %v295_v11 = vsel %vm36_vm0, %v293_v9, %v294_v51  ;;  %v735_v51 = vld [vmem:[#allocation2 + $0x38] sm:$0xf]  ;;  %v768_v5 = vld [vmem:[#allocation2 + $0x44] sm:$0xf]  ;;  %v764_v9 = vld [vmem:[#allocation2 + $0x1c] sm:$0xf0] }
  0xf8   :  { %v296_v12 = vsel %vm135_vm6, %v290_v8, %v295_v11  ;;  %v767_v0 = vld [vmem:[#allocation2 + $0x3c] sm:$0xf]  ;;  %v736_v2 = vor.u32 %v770_v53, %v735_v51  ;;  %v743_v4 = vld [vmem:[#allocation2 + $0x40] sm:$0xf]  ;;  %v711_v8 = vld [vmem:[#allocation2 + $0x8] sm:$0xf] }
  0xf9   :  { %300 = vst [vmem:[#allocation2 + $0x54] sm:$0x33] %v296_v12 }
  0xfc   :  { %v311_v13 = vpop.permute.xlu1 %310  ;;  %v309_v14 = vpop.permute.xlu0 %308 }
  0xfd   :  { %v313_v15 = vrot.slane %v311_v13, 4  ;;  %v312_v16 = vrot.slane %v309_v14, 4  ;;  %v218_v17 = vpop.permute.xlu2 %217 }
  0xfe   :  { %v220_v18 = vrot.slane %v218_v17, 4 }
  0xff   :  { %v316_v19 = vsel %vm155_vm7, %v311_v13, %v313_v15  ;;  %v314_v20 = vsel %vm36_vm0, %v312_v16, %v313_v15 }
 0x100   :  { %320 = vst [vmem:[#allocation2 + $0x5c] sm:$0xc] %v316_v19  ;;  %v315_v21 = vsel %vm155_vm7, %v309_v14, %v314_v20  ;;  %v223_v22 = vsel %vm57_vm2, %v218_v17, %v220_v18 }
 0x101   :  { %319 = vst [vmem:[#allocation2 + $0x54] sm:$0xcc] %v315_v21 }
 0x102   :  { %227 = vst [vmem:[#allocation2 + $0x2c] sm:$0x3] %v223_v22 }
 0x104   :  { %v327_v24 = vpop.permute.xlu1 %326  ;;  %v200_v25 = vpop.permute.xlu0 %199 }
 0x105   :  { %v330_v26 = vrot.slane %v327_v24, 4  ;;  %v202_v27 = vrot.slane %v200_v25, 4 }
 0x107   :  { %v332_v29 = vsel %vm36_vm0, %v330_v26, %v331_v1  ;;  %v203_v30 = vsel %vm36_vm0, %v201_v23, %v202_v27  ;;  %v205_v31 = vsel %vm38_vm1, %v200_v25, %v202_v27  ;;  %v745_v61 = vld [vmem:[#allocation2 + $0x58] sm:$0xf0] }
 0x108   :  { %v333_v32 = vsel %vm174_vm8, %v327_v24, %v332_v29  ;;  %v204_v33 = vsel %vm38_vm1, %v198_v10, %v203_v30  ;;  %209 = vst [vmem:[#allocation2 + $0x14] sm:$0xc] %v205_v31  ;;  %v737_v58 = vld [vmem:[#allocation2 + $0x50] sm:$0xf0]  ;;  %v771_v60 = vld [vmem:[#allocation2 + $0x54] sm:$0xf0]  ;;  %v748_v7 = vor.u32 %v768_v5, %v745_v61  ;;  %v712_v10 = vor.u32 %v764_v9, %v711_v8 }
 0x109   :  { %337 = vst [vmem:[#allocation2 + $0x6c] sm:$0x33] %v333_v32  ;;  %v740_v3 = vor.u32 %v767_v0, %v737_v58  ;;  %v744_v6 = vor.u32 %v771_v60, %v743_v4 }
 0x10a   :  { %208 = vst [vmem:[#allocation2 + $0xc] sm:$0xcc] %v204_v33 }
 0x10c   :  { %v216_v34 = vpop.permute.xlu1 %215  ;;  %v235_v37 = vpop.permute.xlu0 %234 }
 0x10d   :  { %v219_v35 = vrot.slane %v216_v34, 4  ;;  %v238_v45 = vrot.slane %v235_v37, 4 }
 0x10f   :  { %v221_v36 = vsel %vm36_vm0, %v219_v35, %v220_v18  ;;  %v762_v11 = vld [vmem:[#allocation2 + $0x14] sm:$0xf] }
 0x110   :  { %v222_v38 = vsel %vm57_vm2, %v216_v34, %v221_v36  ;;  %v354_v39 = vld [vmem:[#allocation2 + $0x68] sm:$0x33]  ;;  %v355_v40 = vld [vmem:[#allocation2 + $0x70] sm:$0x33] }
 0x111   :  { %226 = vst [vmem:[#allocation2 + $0x24] sm:$0x33] %v222_v38  ;;  %v414_v41 = vunpack.c.l.b16 %v354_v39  ;;  %v415_v42 = vunpack.c.h.b16 %v354_v39  ;;  %v416_v43 = vunpack.c.l.b16 %v355_v40  ;;  %v417_v44 = vunpack.c.h.b16 %v355_v40  ;;  %v761_v13 = vld [vmem:[#allocation2 + $0xc] sm:$0xf]  ;;  %v719_v16 = vld [vmem:[#allocation2 + $0x10] sm:$0xf] }
 0x113   :  { %v432_v46 = vpack.c.b16 %v414_v41, %v414_v41  ;;  %v433_v47 = vpack.c.b16 %v415_v42, %v415_v42  ;;  %v434_v48 = vpack.c.b16 %v416_v43, %v416_v43  ;;  %v435_v49 = vpack.c.b16 %v417_v44, %v417_v44 }
 0x114   :  { %v237_v50 = vpop.permute.xlu1 %236 }
 0x115   :  { %v239_v54 = vrot.slane %v237_v50, 4  ;;  %v460_v55 = vsel %vm452_vm9, %v432_v46, 0  ;;  %v463_v56 = vsel %vm452_vm9, %v433_v47, 0  ;;  %v466_v57 = vsel %vm452_vm9, %v434_v48, 0 }
 0x116   :  { %504 = vmatpush.bf16.msra.mxu2 %v460_v55  ;;  %518 = vmatpush.bf16.msra.mxu3 %v463_v56  ;;  %v469_v59 = vsel %vm452_vm9, %v435_v49, 0 }
 0x117   :  { %v240_v62 = vsel %vm36_vm0, %v238_v45, %v239_v54  ;;  %v242_v63 = vsel %vm77_vm3, %v237_v50, %v239_v54  ;;  %532 = vmatpush.bf16.msrb.mxu0 %v466_v57  ;;  %546 = vmatpush.bf16.msrb.mxu1 %v469_v59 }
 0x118   :  { %v241_v1 = vsel %vm77_vm3, %v235_v37, %v240_v62  ;;  %246 = vst [vmem:[#allocation2 + $0x2c] sm:$0xc] %v242_v63 }
 0x119   :  { %245 = vst [vmem:[#allocation2 + $0x24] sm:$0xcc] %v241_v1 }
 0x11a   :  { %505 = vmatpush.bf16.msra.mxu2 %v736_v2  ;;  %519 = vmatpush.bf16.msra.mxu3 %v740_v3 }
 0x11b   :  { %533 = vmatpush.bf16.msrb.mxu0 %v744_v6  ;;  %547 = vmatpush.bf16.msrb.mxu1 %v748_v7 }
 0x11c   :  { %v988_v25 = vpop.permute.xlu0 %365 }
 0x11e   :  { %506 = vmatpush.bf16.msra.mxu2 %v712_v10 }
 0x11f   :  { %v721_v12 = vld [vmem:[#allocation2 + $0x28] sm:$0xf0] }
 0x120   :  { %v724_v14 = vor.u32 %v762_v11, %v721_v12  ;;  %v713_v15 = vld [vmem:[#allocation2 + $0x20] sm:$0xf0]  ;;  %v765_v17 = vld [vmem:[#allocation2 + $0x24] sm:$0xf0] }
 0x121   :  { %751 = vmatmul.msk.bf16.vlgmr.msra.gmra.mxu2 %vm448_vm10, %v936_v52  ;;  %v716_v18 = vor.u32 %v761_v13, %v713_v15  ;;  %v720_v19 = vor.u32 %v765_v17, %v719_v16 }
 0x122   :  { %548 = vmatpush.bf16.msrb.mxu1 %v724_v14 }
 0x123   :  { %520 = vmatpush.bf16.msra.mxu3 %v716_v18  ;;  %534 = vmatpush.bf16.msrb.mxu0 %v720_v19  ;;  %v984_v22 = vpop.permute.xlu2 %360 }
 0x125   :  { %754 = vmatmul.msk.bf16.vlgmr.msrb.gmra.mxu1 %vm448_vm10, %v936_v52 }
 0x126   :  { %752 = vmatmul.msk.bf16.vlgmr.msra.gmra.mxu3 %vm448_vm10, %v936_v52  ;;  %753 = vmatmul.msk.bf16.vlgmr.msrb.gmra.mxu0 %vm448_vm10, %v936_v52 }
 0x15e   :  { %v480_v20 = vpop.f32.mrf.mxu0  ;;  %v494_v21 = vpop.f32.mrf.mxu1 }
 0x15f   :  { %v481_v23 = vadd.f32 %v480_v20, %v984_v22  ;;  %v495_v24 = vadd.f32 %v494_v21, %v984_v22 }
 0x161   :  { %v555_v26 = vmin.f32 %v481_v23, 30.0  ;;  %v556_v27 = vmin.f32 %v495_v24, 30.0 }
 0x163   :  { %v567_v28 = vmul.f32 1.442695, %v555_v26  ;;  %v569_v29 = vmul.f32 1.442695, %v556_v27 }
 0x165   :  { %783 = vpow2.f32 %v567_v28 }
 0x166   :  { %v482_v30 = vpop.f32.mrf.mxu0  ;;  %v496_v31 = vpop.f32.mrf.mxu1  ;;  %785 = vpow2.f32 %v569_v29 }
 0x167   :  { %v483_v32 = vadd.f32 %v482_v30, %v988_v25  ;;  %v497_v52 = vadd.f32 %v496_v31, %v988_v25 }
 0x169   :  { %v561_v33 = vmin.f32 %v483_v32, 30.0  ;;  %v562_v34 = vmin.f32 %v497_v52, 30.0 }
 0x16b   :  { %v579_v35 = vmul.f32 1.442695, %v561_v33  ;;  %v581_v36 = vmul.f32 1.442695, %v562_v34  ;;  %v784_v37 = vpop.eup %783 }
 0x16c   :  { %v786_v38 = vpop.eup %785  ;;  %v591_v39 = vadd.f32 2.0, %v784_v37 }
 0x16d   :  { %787 = vpow2.f32 %v579_v35  ;;  %v592_v40 = vadd.f32 2.0, %v786_v38 }
 0x16e   :  { %789 = vpow2.f32 %v581_v36  ;;  %v603_v41 = vmul.f32 %v784_v37, %v591_v39 }
 0x16f   :  { %v604_v42 = vmul.f32 %v786_v38, %v592_v40 }
 0x170   :  { %v627_v44 = vadd.f32 2.0, %v603_v41  ;;  %v615_v51 = vmul.f32 %v603_v41, %v481_v23 }
 0x171   :  { %v628_v46 = vadd.f32 2.0, %v604_v42  ;;  %v616_v54 = vmul.f32 %v604_v42, %v495_v24 }
 0x172   :  { %791 = vrcp.f32 %v627_v44 }
 0x173   :  { %v788_v43 = vpop.eup %787  ;;  %793 = vrcp.f32 %v628_v46 }
 0x174   :  { %v790_v45 = vpop.eup %789  ;;  %v597_v47 = vadd.f32 2.0, %v788_v43 }
 0x175   :  { %v598_v48 = vadd.f32 2.0, %v790_v45 }
 0x176   :  { %v609_v49 = vmul.f32 %v788_v43, %v597_v47 }
 0x177   :  { %v610_v50 = vmul.f32 %v790_v45, %v598_v48 }
 0x178   :  { %v633_v53 = vadd.f32 2.0, %v609_v49  ;;  %v792_v56 = vpop.eup %791  ;;  %v621_v60 = vmul.f32 %v609_v49, %v483_v32 }
 0x179   :  { %v634_v55 = vadd.f32 2.0, %v610_v50  ;;  %v794_v57 = vpop.eup %793  ;;  %v651_v58 = vmul.f32 %v792_v56, %v615_v51  ;;  %v622_v61 = vmul.f32 %v610_v50, %v497_v52 }
 0x17a   :  { %795 = vrcp.f32 %v633_v53  ;;  %v652_v59 = vmul.f32 %v794_v57, %v616_v54 }
 0x17b   :  { %797 = vrcp.f32 %v634_v55 }
 0x17c   :  { %v663_v62 = vpack.c.bf16 %v652_v59, %v651_v58 }
 0x17e   :  { %669 = vst [vmem:[%s1061_s3] sm:$0xff] %v663_v62 }
 0x180   :  { %v796_v63 = vpop.eup %795 }
 0x181   :  { %v798_v0 = vpop.eup %797  ;;  %v657_v1 = vmul.f32 %v796_v63, %v621_v60 }
 0x182   :  { %v658_v2 = vmul.f32 %v798_v0, %v622_v61 }
 0x184   :  { %v666_v3 = vpack.c.bf16 %v658_v2, %v657_v1 }
 0x186   :  { %671 = vst [vmem:[%s1061_s3 + $0xc] sm:$0xff] %v666_v3 }
 0x1a2   :  { %v550_v4 = vpop.f32.mrf.mxu1 }
 0x1a3   :  { %v999_v5 = vadd.f32 %v550_v4, %v984_v22  ;;  %v536_v6 = vpop.f32.mrf.mxu0 }
 0x1a4   :  { %v1002_v7 = vadd.f32 %v536_v6, %v984_v22  ;;  %v508_v8 = vpop.f32.mrf.mxu2 }
 0x1a5   :  { %v560_v9 = vmin.f32 %v999_v5, 30.0  ;;  %v1006_v10 = vadd.f32 %v508_v8, %v984_v22 }
 0x1a6   :  { %v559_v11 = vmin.f32 %v1002_v7, 30.0 }
 0x1a7   :  { %v577_v12 = vmul.f32 1.442695, %v560_v9  ;;  %v557_v13 = vmin.f32 %v1006_v10, 30.0 }
 0x1a8   :  { %v575_v14 = vmul.f32 1.442695, %v559_v11 }
 0x1a9   :  { %799 = vpow2.f32 %v577_v12  ;;  %v571_v15 = vmul.f32 1.442695, %v557_v13  ;;  %v522_v16 = vpop.f32.mrf.mxu3 }
 0x1aa   :  { %801 = vpow2.f32 %v575_v14  ;;  %v1011_v17 = vadd.f32 %v522_v16, %v984_v22  ;;  %v552_v18 = vpop.f32.mrf.mxu1 }
 0x1ab   :  { %803 = vpow2.f32 %v571_v15  ;;  %v1014_v19 = vadd.f32 %v552_v18, %v988_v25  ;;  %v538_v20 = vpop.f32.mrf.mxu0 }
 0x1ac   :  { %v558_v21 = vmin.f32 %v1011_v17, 30.0  ;;  %v1018_v23 = vadd.f32 %v538_v20, %v988_v25  ;;  %v510_v24 = vpop.f32.mrf.mxu2 }
 0x1ad   :  { %v566_v26 = vmin.f32 %v1014_v19, 30.0  ;;  %v1022_v27 = vadd.f32 %v510_v24, %v988_v25 }
 0x1ae   :  { %v573_v28 = vmul.f32 1.442695, %v558_v21  ;;  %v565_v22 = vmin.f32 %v1018_v23, 30.0 }
 0x1af   :  { %v800_v29 = vpop.eup %799  ;;  %v589_v30 = vmul.f32 1.442695, %v566_v26  ;;  %v563_v31 = vmin.f32 %v1022_v27, 30.0 }
 0x1b0   :  { %v802_v32 = vpop.eup %801  ;;  %v596_v52 = vadd.f32 2.0, %v800_v29  ;;  %805 = vpow2.f32 %v573_v28  ;;  %v587_v33 = vmul.f32 1.442695, %v565_v22 }
 0x1b1   :  { %v804_v34 = vpop.eup %803  ;;  %v595_v35 = vadd.f32 2.0, %v802_v32  ;;  %807 = vpow2.f32 %v589_v30  ;;  %v583_v36 = vmul.f32 1.442695, %v563_v31  ;;  %v524_v37 = vpop.f32.mrf.mxu3 }
 0x1b2   :  { %v608_v38 = vmul.f32 %v800_v29, %v596_v52  ;;  %v593_v39 = vadd.f32 2.0, %v804_v34  ;;  %809 = vpow2.f32 %v587_v33  ;;  %v1027_v40 = vadd.f32 %v524_v37, %v988_v25 }
 0x1b3   :  { %v607_v41 = vmul.f32 %v802_v32, %v595_v35  ;;  %811 = vpow2.f32 %v583_v36 }
 0x1b4   :  { %v632_v42 = vadd.f32 2.0, %v608_v38  ;;  %v605_v43 = vmul.f32 %v804_v34, %v593_v39  ;;  %v564_v44 = vmin.f32 %v1027_v40, 30.0  ;;  %v620_v58 = vmul.f32 %v608_v38, %v999_v5 }
 0x1b5   :  { %v631_v45 = vadd.f32 2.0, %v607_v41  ;;  %v619_v62 = vmul.f32 %v607_v41, %v1002_v7 }
 0x1b6   :  { %v806_v46 = vpop.eup %805  ;;  %813 = vrcp.f32 %v632_v42  ;;  %v585_v47 = vmul.f32 1.442695, %v564_v44  ;;  %v629_v49 = vadd.f32 2.0, %v605_v43  ;;  %v617_v13 = vmul.f32 %v605_v43, %v1006_v10 }
 0x1b7   :  { %v808_v48 = vpop.eup %807  ;;  %815 = vrcp.f32 %v631_v45  ;;  %v594_v50 = vadd.f32 2.0, %v806_v46 }
 0x1b8   :  { %v810_v51 = vpop.eup %809  ;;  %v602_v53 = vadd.f32 2.0, %v808_v48  ;;  %817 = vpow2.f32 %v585_v47 }
 0x1b9   :  { %v812_v54 = vpop.eup %811  ;;  %v606_v55 = vmul.f32 %v806_v46, %v594_v50  ;;  %v601_v25 = vadd.f32 2.0, %v810_v51  ;;  %819 = vrcp.f32 %v629_v49 }
 0x1ba   :  { %v614_v56 = vmul.f32 %v808_v48, %v602_v53  ;;  %v599_v57 = vadd.f32 2.0, %v812_v54 }
 0x1bb   :  { %v630_v59 = vadd.f32 2.0, %v606_v55  ;;  %v613_v60 = vmul.f32 %v810_v51, %v601_v25  ;;  %v618_v14 = vmul.f32 %v606_v55, %v1011_v17 }
 0x1bc   :  { %v814_v61 = vpop.eup %813  ;;  %v638_v63 = vadd.f32 2.0, %v614_v56  ;;  %v611_v0 = vmul.f32 %v812_v54, %v599_v57  ;;  %v626_v16 = vmul.f32 %v614_v56, %v1014_v19 }
 0x1bd   :  { %v816_v1 = vpop.eup %815  ;;  %v656_v2 = vmul.f32 %v814_v61, %v620_v58  ;;  %821 = vrcp.f32 %v630_v59  ;;  %v637_v3 = vadd.f32 2.0, %v613_v60  ;;  %v625_v18 = vmul.f32 %v613_v60, %v1018_v23 }
 0x1be   :  { %v655_v4 = vmul.f32 %v816_v1, %v619_v62  ;;  %823 = vrcp.f32 %v638_v63  ;;  %v818_v6 = vpop.eup %817  ;;  %v635_v9 = vadd.f32 2.0, %v611_v0  ;;  %v623_v32 = vmul.f32 %v611_v0, %v1022_v27 }
 0x1bf   :  { %825 = vrcp.f32 %v637_v3  ;;  %v600_v11 = vadd.f32 2.0, %v818_v6  ;;  %v820_v5 = vpop.eup %819 }
 0x1c0   :  { %v665_v8 = vpack.c.bf16 %v656_v2, %v655_v4  ;;  %v653_v21 = vmul.f32 %v820_v5, %v617_v13  ;;  %827 = vrcp.f32 %v635_v9 }
 0x1c1   :  { %v612_v7 = vmul.f32 %v818_v6, %v600_v11 }
 0x1c2   :  { %v678_v12 = vrot.slane %v665_v8, 4 }
 0x1c3   :  { %v822_v15 = vpop.eup %821  ;;  %v636_v26 = vadd.f32 2.0, %v612_v7  ;;  %v624_v52 = vmul.f32 %v612_v7, %v1027_v40 }
 0x1c4   :  { %v824_v20 = vpop.eup %823  ;;  %756 = vst [vmem:[%s1061_s3 + $0x20] sm:$0xf] %v678_v12  ;;  %v654_v24 = vmul.f32 %v822_v15, %v618_v14 }
 0x1c5   :  { %v826_v28 = vpop.eup %825  ;;  %v662_v22 = vmul.f32 %v824_v20, %v626_v16  ;;  %829 = vrcp.f32 %v636_v26 }
 0x1c6   :  { %v664_v10 = vpack.c.bf16 %v654_v24, %v653_v21  ;;  %v661_v29 = vmul.f32 %v826_v28, %v625_v18  ;;  %v828_v23 = vpop.eup %827 }
 0x1c7   :  { %v659_v34 = vmul.f32 %v828_v23, %v623_v32 }
 0x1c8   :  { %670 = vst [vmem:[%s1061_s3 + $0x8] sm:$0xf] %v664_v10  ;;  %v677_v17 = vrot.slane %v664_v10, 4  ;;  %v668_v19 = vpack.c.bf16 %v662_v22, %v661_v29 }
 0x1ca   :  { %v681_v30 = vsel %vm36_vm0, %v677_v17, %v678_v12  ;;  %v680_v31 = vrot.slane %v668_v19, 4 }
 0x1cb   :  { %755 = vst [vmem:[%s1061_s3 + $0x18] sm:$0xff] %v681_v30  ;;  %v830_v33 = vpop.eup %829 }
 0x1cc   :  { %758 = vst [vmem:[%s1061_s3 + $0x2c] sm:$0xf] %v680_v31  ;;  %v660_v35 = vmul.f32 %v830_v33, %v624_v52 }
 0x1ce   :  { %v667_v36 = vpack.c.bf16 %v660_v35, %v659_v34 }
 0x1d0   :  { %672 = vst [vmem:[%s1061_s3 + $0x14] sm:$0xf] %v667_v36  ;;  %v679_v37 = vrot.slane %v667_v36, 4 }
 0x1d2   :  { %v682_v38 = vsel %vm36_vm0, %v679_v37, %v680_v31 }
 0x1d3   :  { %757 = vst [vmem:[%s1061_s3 + $0x24] sm:$0xff] %v682_v38 }

</bundles_post_ra>
